<compile_context>
chip_gen: v7x
topology: tpu7x:2x2x1
jax: 0.10.0
libtpu: 0.0.40
codegen_flags: <defaults>
</compile_context>

<pallas_src>
import jax
import jax.numpy as jnp
from jax.experimental import pallas as pl
from jax.experimental.pallas import tpu as pltpu

# Logical hidden sizes from the nn.Sequential definition, and their lane-padded
# counterparts (128-multiples).
H1, H2, H3 = 100, 300, 400
H1P, H2P, H3P = 128, 384, 512


def _round_up(n, m):
    return (n + m - 1) // m * m


def mlp_kernel(x_ref, w1_ref, b1_ref, w2_ref, b2_ref, w3_ref, b3_ref,
               w4_ref, b4_ref, o_ref):
    # Layer 1: bf16 matmul on the MXU with f32 accumulation, bias/ReLU in f32.
    h = jnp.dot(x_ref[...], w1_ref[...], preferred_element_type=jnp.float32)
    h = jnp.maximum(h + b1_ref[...], 0.0)

    # Layer 2
    h = jnp.dot(h.astype(jnp.bfloat16), w2_ref[...],
                preferred_element_type=jnp.float32)
    h = jnp.maximum(h + b2_ref[...], 0.0)

    # Layer 3
    h = jnp.dot(h.astype(jnp.bfloat16), w3_ref[...],
                preferred_element_type=jnp.float32)
    h = jnp.maximum(h + b3_ref[...], 0.0)

    # Layer 4 (no ReLU). Output tile is lane-dense (padded to 128 lanes).
    h = jnp.dot(h.astype(jnp.bfloat16), w4_ref[...],
                preferred_element_type=jnp.float32)
    o_ref[...] = (h + b4_ref[...]).astype(o_ref.dtype)


def mlp_forward(x, params, output_size, *, batch_tile=1024,
                out_dtype=jnp.float32):
    """x: (B, input_size) float32 (or bf16).

    params: dict of bf16 weights w1..w4 with shape (in_dim, out_pad) -- layer 1
    keeps the true input feature dim, hidden/output dims are 128-padded -- and
    f32 biases b1..b4 of shape (1, out_pad), as produced by init_params.
    """
    B, in_size = x.shape
    assert params["w1"].shape[0] == in_size, "params/input feature-dim mismatch"
    out_pad = params["w4"].shape[1]

    # Batch tile: big enough to fill the MXU M dim and amortize per-grid-step
    # overhead; multiple of 8 (sublane); at least 2 grid steps when B allows so
    # v7x's two TensorCores both get work.
    tb = min(batch_tile, _round_up(pl.cdiv(B, 2), 8))
    tb = max(8, _round_up(tb, 8))
    grid = (pl.cdiv(B, tb),)

    # bf16 activations for the MXU (also halves the x-tile DMA bytes). No
    # zero-padding of batch or features is materialized: Pallas masks the
    # trailing partial batch block, and layer 1's K dim stays at in_size.
    xb = x.astype(jnp.bfloat16)

    def batch_map(i):
        return (i, 0)

    def whole_map(i):
        return (0, 0)

    # Weights / biases: full-array blocks with constant index_maps, so they are
    # fetched once and stay resident in VMEM across the batch grid (<~1.5 MB of
    # bf16 weights for typical in/out sizes).
    w_spec = lambda a: pl.BlockSpec(a.shape, whole_map)

    out = pl.pallas_call(
        mlp_kernel,
        out_shape=jax.ShapeDtypeStruct((B, out_pad), out_dtype),
        grid_spec=pltpu.PrefetchScalarGridSpec(
            num_scalar_prefetch=0,
            grid=grid,
            in_specs=[
                pl.BlockSpec((tb, in_size), batch_map),
                w_spec(params["w1"]), w_spec(params["b1"]),
                w_spec(params["w2"]), w_spec(params["b2"]),
                w_spec(params["w3"]), w_spec(params["b3"]),
                w_spec(params["w4"]), w_spec(params["b4"]),
            ],
            out_specs=pl.BlockSpec((tb, out_pad), batch_map),
        ),
        # Batch axis is embarrassingly parallel -> megacore sharding on v7x.
        # 48 MiB scoped VMEM: enough for tb up to ~2048 with f32 intermediates,
        # and under every generation's physical VMEM (v7x = 64 MiB).
        compiler_params=pltpu.CompilerParams(
            dimension_semantics=("parallel",),
            vmem_limit_bytes=48 * 1024 * 1024),
    )(xb, params["w1"], params["b1"], params["w2"], params["b2"],
      params["w3"], params["b3"], params["w4"], params["b4"])

    # Strip lane padding of the output features outside the kernel.
    return out[:, :output_size]


def init_params(key, input_size, output_size):
    """PyTorch-default-style init, stored transposed (in, out).

    Hidden/output feature dims are padded to 128-multiples; padded rows/columns
    are zero so they contribute nothing and padded activation lanes stay exactly
    0 through every ReLU. Layer 1 keeps the true input feature dim (no K pad).
    """
    out_pad = _round_up(output_size, 128)
    dims = [
        (input_size, input_size, H1, H1P),
        (H1, H1P, H2, H2P),
        (H2, H2P, H3, H3P),
        (H3, H3P, output_size, out_pad),
    ]
    params = {}
    for idx, (fi, fi_p, fo, fo_p) in enumerate(dims, start=1):
        key, kw, kb = jax.random.split(key, 3)
        bound = 1.0 / jnp.sqrt(fi)  # PyTorch default nn.Linear init range
        w = jax.random.uniform(kw, (fi, fo), jnp.float32, -bound, bound)
        b = jax.random.uniform(kb, (fo,), jnp.float32, -bound, bound)
        w_pad = jnp.zeros((fi_p, fo_p), jnp.float32).at[:fi, :fo].set(w)
        b_pad = jnp.zeros((1, fo_p), jnp.float32).at[0, :fo].set(b)
        params[f"w{idx}"] = w_pad.astype(jnp.bfloat16)   # MXU-native dtype
        params[f"b{idx}"] = b_pad                        # bias-add stays f32
    return params


def mlp_reference(x, params, output_size):
    """Pure-JAX reference with the same bf16-matmul / f32-accumulate recipe."""
    h = x.astype(jnp.bfloat16)
    for i in range(1, 5):
        h = jnp.dot(h, params[f"w{i}"], preferred_element_type=jnp.float32)
        h = h + params[f"b{i}"]
        if i < 4:
            h = jnp.maximum(h, 0.0).astype(jnp.bfloat16)
    return h[:, :output_size]


if __name__ == "__main__":
    input_size, output_size = 32, 10
    batch = 64

    key = jax.random.PRNGKey(0)
    key, kx = jax.random.split(key)
    x = jax.random.normal(kx, (batch, input_size), jnp.float32)
    params = init_params(key, input_size, output_size)

    # Default batch_tile=1024; with batch=64 the >=2-step rule yields tb=32 and
    # a 2-step grid, exercising the pipeline / v7x megacore path.
    out = mlp_forward(x, params, output_size)
    out = jax.block_until_ready(out)

    ref = mlp_reference(x, params, output_size)
    assert out.shape == (batch, output_size)
    assert jnp.allclose(out, ref, atol=2e-2, rtol=2e-2), "mismatch vs reference"

    print("KERNEL_OK")
</pallas_src>

<mosaic_0001>
module attributes {stable_mosaic.version = 11 : i64} {
  func.func @mlp_kernel(%arg0: i32, %arg1: memref<32x32xbf16, #tpu.memory_space<vmem>>, %arg2: memref<32x128xbf16, #tpu.memory_space<vmem>>, %arg3: memref<1x128xf32, #tpu.memory_space<vmem>>, %arg4: memref<128x384xbf16, #tpu.memory_space<vmem>>, %arg5: memref<1x384xf32, #tpu.memory_space<vmem>>, %arg6: memref<384x512xbf16, #tpu.memory_space<vmem>>, %arg7: memref<1x512xf32, #tpu.memory_space<vmem>>, %arg8: memref<512x128xbf16, #tpu.memory_space<vmem>>, %arg9: memref<1x128xf32, #tpu.memory_space<vmem>>, %arg10: memref<32x128xf32, #tpu.memory_space<vmem>>) attributes {dimension_semantics = [#tpu.dimension_semantics<parallel>], iteration_bounds = array<i64: 2>, scalar_prefetch = 0 : i64, scratch_operands = 0 : i64, tpu.core_type = #tpu.core_type<tc>, window_params = [{transform_indices = @transform_0, window_bounds = array<i64: 32, 32>}, {pipeline_mode = #tpu.pipeline_mode<synchronous>, transform_indices = @transform_1, window_bounds = array<i64: 32, 128>}, {pipeline_mode = #tpu.pipeline_mode<synchronous>, transform_indices = @transform_2, window_bounds = array<i64: 1, 128>}, {pipeline_mode = #tpu.pipeline_mode<synchronous>, transform_indices = @transform_3, window_bounds = array<i64: 128, 384>}, {pipeline_mode = #tpu.pipeline_mode<synchronous>, transform_indices = @transform_4, window_bounds = array<i64: 1, 384>}, {pipeline_mode = #tpu.pipeline_mode<synchronous>, transform_indices = @transform_5, window_bounds = array<i64: 384, 512>}, {pipeline_mode = #tpu.pipeline_mode<synchronous>, transform_indices = @transform_6, window_bounds = array<i64: 1, 512>}, {pipeline_mode = #tpu.pipeline_mode<synchronous>, transform_indices = @transform_7, window_bounds = array<i64: 512, 128>}, {pipeline_mode = #tpu.pipeline_mode<synchronous>, transform_indices = @transform_8, window_bounds = array<i64: 1, 128>}, {transform_indices = @transform_9, window_bounds = array<i64: 32, 128>}]} {
    %c0 = arith.constant 0 : index
    %c0_0 = arith.constant 0 : index
    %0 = vector.load %arg1[%c0, %c0_0] : memref<32x32xbf16, #tpu.memory_space<vmem>>, vector<32x32xbf16>
    %c0_1 = arith.constant 0 : index
    %c0_2 = arith.constant 0 : index
    %1 = vector.load %arg2[%c0_1, %c0_2] : memref<32x128xbf16, #tpu.memory_space<vmem>>, vector<32x128xbf16>
    %cst = arith.constant dense<0.000000e+00> : vector<32x128xf32>
    %2 = tpu.matmul %0, %1, %cst {dimension_numbers = #tpu.dot_dimension_numbers<[1], [0], [0], [1], [0, 0, 1, 1], [], []>} : vector<32x32xbf16>, vector<32x128xbf16>, vector<32x128xf32> -> vector<32x128xf32>
    %c0_3 = arith.constant 0 : index
    %c0_4 = arith.constant 0 : index
    %3 = vector.load %arg3[%c0_3, %c0_4] : memref<1x128xf32, #tpu.memory_space<vmem>>, vector<1x128xf32>
    %4 = vector.broadcast %3 : vector<1x128xf32> to vector<32x128xf32>
    %5 = arith.addf %2, %4 : vector<32x128xf32>
    %cst_5 = arith.constant 0.000000e+00 : f32
    %6 = vector.broadcast %cst_5 : f32 to vector<32x128xf32>
    %7 = arith.maximumf %5, %6 : vector<32x128xf32>
    %8 = arith.truncf %7 : vector<32x128xf32> to vector<32x128xbf16>
    %c0_6 = arith.constant 0 : index
    %c0_7 = arith.constant 0 : index
    %9 = vector.load %arg4[%c0_6, %c0_7] : memref<128x384xbf16, #tpu.memory_space<vmem>>, vector<128x384xbf16>
    %cst_8 = arith.constant dense<0.000000e+00> : vector<32x384xf32>
    %10 = tpu.matmul %8, %9, %cst_8 {dimension_numbers = #tpu.dot_dimension_numbers<[1], [0], [0], [1], [0, 0, 1, 1], [], []>} : vector<32x128xbf16>, vector<128x384xbf16>, vector<32x384xf32> -> vector<32x384xf32>
    %c0_9 = arith.constant 0 : index
    %c0_10 = arith.constant 0 : index
    %11 = vector.load %arg5[%c0_9, %c0_10] : memref<1x384xf32, #tpu.memory_space<vmem>>, vector<1x384xf32>
    %12 = vector.broadcast %11 : vector<1x384xf32> to vector<32x384xf32>
    %13 = arith.addf %10, %12 : vector<32x384xf32>
    %cst_11 = arith.constant 0.000000e+00 : f32
    %14 = vector.broadcast %cst_11 : f32 to vector<32x384xf32>
    %15 = arith.maximumf %13, %14 : vector<32x384xf32>
    %16 = arith.truncf %15 : vector<32x384xf32> to vector<32x384xbf16>
    %c0_12 = arith.constant 0 : index
    %c0_13 = arith.constant 0 : index
    %17 = vector.load %arg6[%c0_12, %c0_13] : memref<384x512xbf16, #tpu.memory_space<vmem>>, vector<384x512xbf16>
    %cst_14 = arith.constant dense<0.000000e+00> : vector<32x512xf32>
    %18 = tpu.matmul %16, %17, %cst_14 {dimension_numbers = #tpu.dot_dimension_numbers<[1], [0], [0], [1], [0, 0, 1, 1], [], []>} : vector<32x384xbf16>, vector<384x512xbf16>, vector<32x512xf32> -> vector<32x512xf32>
    %c0_15 = arith.constant 0 : index
    %c0_16 = arith.constant 0 : index
    %19 = vector.load %arg7[%c0_15, %c0_16] : memref<1x512xf32, #tpu.memory_space<vmem>>, vector<1x512xf32>
    %20 = vector.broadcast %19 : vector<1x512xf32> to vector<32x512xf32>
    %21 = arith.addf %18, %20 : vector<32x512xf32>
    %cst_17 = arith.constant 0.000000e+00 : f32
    %22 = vector.broadcast %cst_17 : f32 to vector<32x512xf32>
    %23 = arith.maximumf %21, %22 : vector<32x512xf32>
    %24 = arith.truncf %23 : vector<32x512xf32> to vector<32x512xbf16>
    %c0_18 = arith.constant 0 : index
    %c0_19 = arith.constant 0 : index
    %25 = vector.load %arg8[%c0_18, %c0_19] : memref<512x128xbf16, #tpu.memory_space<vmem>>, vector<512x128xbf16>
    %cst_20 = arith.constant dense<0.000000e+00> : vector<32x128xf32>
    %26 = tpu.matmul %24, %25, %cst_20 {dimension_numbers = #tpu.dot_dimension_numbers<[1], [0], [0], [1], [0, 0, 1, 1], [], []>} : vector<32x512xbf16>, vector<512x128xbf16>, vector<32x128xf32> -> vector<32x128xf32>
    %c0_21 = arith.constant 0 : index
    %c0_22 = arith.constant 0 : index
    %27 = vector.load %arg9[%c0_21, %c0_22] : memref<1x128xf32, #tpu.memory_space<vmem>>, vector<1x128xf32>
    %28 = vector.broadcast %27 : vector<1x128xf32> to vector<32x128xf32>
    %29 = arith.addf %26, %28 : vector<32x128xf32>
    %c0_23 = arith.constant 0 : index
    %c0_24 = arith.constant 0 : index
    %30 = vector.load %arg10[%c0_23, %c0_24] : memref<32x128xf32, #tpu.memory_space<vmem>>, vector<32x128xf32>
    tpu.vector_store %arg10[%c0_23, %c0_24], %29 {strides = array<i32>} : memref<32x128xf32, #tpu.memory_space<vmem>>, vector<32x128xf32>,
    return
  }
  func.func @transform_0(%arg0: i32) -> (i32, i32) {
    %c0_i32 = arith.constant 0 : i32
    %c0_i32_0 = arith.constant 0 : i32
    return %arg0, %c0_i32 : i32, i32
  }
  func.func @transform_1(%arg0: i32) -> (i32, i32) {
    %c0_i32 = arith.constant 0 : i32
    %c0_i32_0 = arith.constant 0 : i32
    %c0_i32_1 = arith.constant 0 : i32
    return %c0_i32, %c0_i32_0 : i32, i32
  }
  func.func @transform_2(%arg0: i32) -> (i32, i32) {
    %c0_i32 = arith.constant 0 : i32
    %c0_i32_0 = arith.constant 0 : i32
    %c0_i32_1 = arith.constant 0 : i32
    return %c0_i32, %c0_i32_0 : i32, i32
  }
  func.func @transform_3(%arg0: i32) -> (i32, i32) {
    %c0_i32 = arith.constant 0 : i32
    %c0_i32_0 = arith.constant 0 : i32
    %c0_i32_1 = arith.constant 0 : i32
    return %c0_i32, %c0_i32_0 : i32, i32
  }
  func.func @transform_4(%arg0: i32) -> (i32, i32) {
    %c0_i32 = arith.constant 0 : i32
    %c0_i32_0 = arith.constant 0 : i32
    %c0_i32_1 = arith.constant 0 : i32
    return %c0_i32, %c0_i32_0 : i32, i32
  }
  func.func @transform_5(%arg0: i32) -> (i32, i32) {
    %c0_i32 = arith.constant 0 : i32
    %c0_i32_0 = arith.constant 0 : i32
    %c0_i32_1 = arith.constant 0 : i32
    return %c0_i32, %c0_i32_0 : i32, i32
  }
  func.func @transform_6(%arg0: i32) -> (i32, i32) {
    %c0_i32 = arith.constant 0 : i32
    %c0_i32_0 = arith.constant 0 : i32
    %c0_i32_1 = arith.constant 0 : i32
    return %c0_i32, %c0_i32_0 : i32, i32
  }
  func.func @transform_7(%arg0: i32) -> (i32, i32) {
    %c0_i32 = arith.constant 0 : i32
    %c0_i32_0 = arith.constant 0 : i32
    %c0_i32_1 = arith.constant 0 : i32
    return %c0_i32, %c0_i32_0 : i32, i32
  }
  func.func @transform_8(%arg0: i32) -> (i32, i32) {
    %c0_i32 = arith.constant 0 : i32
    %c0_i32_0 = arith.constant 0 : i32
    %c0_i32_1 = arith.constant 0 : i32
    return %c0_i32, %c0_i32_0 : i32, i32
  }
  func.func @transform_9(%arg0: i32) -> (i32, i32) {
    %c0_i32 = arith.constant 0 : i32
    %c0_i32_0 = arith.constant 0 : i32
    return %arg0, %c0_i32 : i32, i32
  }
}

</mosaic_0001>

<bundles_post_ra>
// kernel: tpu_custom_call.1
= control target key start
LH: loop header
LB: loop body
LE: loop exit
PB: predicated region body
PF: predicated region fallthrough
CT: control target
= control target key end

     0   :  { %s3148_s0 = inlined_call_operand.vmem [shape: bf16[64,32], index: 0, kind: input, shape index: {}]   ;;  %s3149_s1 = inlined_call_operand.vmem [shape: bf16[32,128], index: 1, kind: input, shape index: {}]   ;;  %s3150_s2 = inlined_call_operand.vmem [shape: f32[1,128], index: 2, kind: input, shape index: {}]   ;;  %s3151_s3 = inlined_call_operand.hbm [shape: bf16[128,384], index: 3, kind: input, shape index: {}]   ;;  %s3152_s4 = inlined_call_operand.vmem [shape: f32[1,384], index: 4, kind: input, shape index: {}]   ;;  %s3153_s5 = inlined_call_operand.hbm [shape: bf16[384,512], index: 5, kind: input, shape index: {}]   ;;  %s3154_s6 = inlined_call_operand.vmem [shape: f32[1,512], index: 6, kind: input, shape index: {}]   ;;  %s3155_s7 = inlined_call_operand.hbm [shape: bf16[512,128], index: 7, kind: input, shape index: {}]   ;;  %s3156_s8 = inlined_call_operand.vmem [shape: f32[1,128], index: 8, kind: input, shape index: {}]   ;;  %s3157_s9 = inlined_call_operand.hbm [shape: f32[64,128], index: 9, kind: output, shape index: {}]  }
   0x1   :  { %3165 = sst [smem:[#allocation16_spill]] %s3153_s5 }
   0x2   :  { %14 = vsyncpa [#allocation3], 0 }
   0x3   :  { %15 = vsyncpa [#allocation6], 0 }
   0x4   :  { %16 = vsyncpa [#allocation4], 0 }
   0x5   :  { %18 = vsyncpa [#allocation4 + $0x1], 0  ;;  %s2900_s30 = smov 0   ;;  %s2902_s10 = smov 0  }
   0x6   :  { %s2904_s11 = smov 0   ;;  %s2906_s12 = smov 0  }
   0x7 LB: > { %3166 = sst [smem:[#allocation12_spill]] %s2831_s11  ;;  %s2921_s13 = sadd.s32 4294967295, %s2835_s12   ;;  %s2835_s12 = sphi %s2906_s12, %s3184_s12   ;;  %s2831_s11 = sphi %s2904_s11, %s3186_s11   ;;  %s2827_s10 = sphi %s2902_s10, %s3188_s10   ;;  %s2823_s30 = sphi %s2900_s30, %s3187_s30  }
   0x8   : > { %s2081_s14 = sadd.s32 4294967294, %s2835_s12   ;;  %s2925_s15 = sadd.s32 1, %s2835_s12  }
   0x9   : > { %3167 = sst [smem:[#allocation13_spill]] %s2925_s15  ;;  %s225_s16 = sadd.s32 1, %s2831_s11 }
   0xa   : > { %s222_s17 = ssub.s32 %s2835_s12, %s2925_s15  ;;  %p235_p0 = scmp.ne.s32.totalorder %s2831_s11, %s2827_s10 }
   0xb   : > { %p223_p1 = scmp.eq.s32.totalorder %s222_s17, 0  ;;  %p236_p2 = scmp.eq.s32.totalorder %s2921_s13, 1 }
   0xc   : > { %p241_p3 = scmp.ne.s32.totalorder %s2827_s10, %s2823_s30  ;;  %p242_p4 = scmp.eq.s32.totalorder %s2081_s14, 1 }
   0xd   : > { %s2936_s18 = scalar_select %p223_p1, %s2831_s11, %s225_s16  }
   0xe   : > { %p2938_p5 = por %p236_p2, %p235_p0  ;;  %p2942_p6 = por %p242_p4, %p241_p3 }
   0xf   : > { %3168 = sst [smem:[#allocation14_spill]] %s2936_s18  ;;  %p2082_p7 = scmp.ge.s32.totalorder %s2835_s12, 1 }
  0x10   : > { %s3169_s19 = scalar_select %p2938_p5, 1, 0 }
  0x11   : > { %s3170_s20 = scalar_select %p2942_p6, 1, 0 }
  0x12   : > { %p249_p8 = scmp.lt.s32.totalorder %s2835_s12, 3  ;;  %p3158_p9 = scmp.eq.s32.totalorder %s2921_s13, 0 }
  0x13   : > { %3171 = sst [smem:[#allocation15_spill]] %s3170_s20  ;;  %s2837_s22 = smov [#allocation5]  }
  0x14   : > { %p2949_p10 = pnand %p2082_p7, %p249_p8  ;;  %s283_s23 = sshll.u32 %s2837_s22, 4  ;;  %s284_s23 = int_to_ptr.vmem [resolvable:$true] %s283_s23 }
  0x15   : > { %s2838_s25 = smov [#allocation2]   ;;  %s3174_s5 = sld [smem:[#allocation16_spill]] }
  0x16   : > { %s3172_s21 = scalar_select %p2949_p10, 1, 0 }
  0x17   : > { %p2404_p11 = pneg %p2949_p10  ;;  %s267_s26 = sshll.u32 %s2838_s25, 4  ;;  %s2961_s26 = int_to_ptr.vmem [resolvable:$true] %s267_s26 }
  0x19   : > { %p2957_p12 = pnand %p3158_p9, %p2404_p11 }
  0x1b   : > { %s2681_s29 = scalar_lea.hbm %s3174_s5, 12288  ;;  %p2971_p0 = pneg %p2957_p12 }
  0x1c   : > { %p2682_p13 = scmp.ne.s32.totalorder %s3174_s5, %s2681_s29  ;;  %p2688_p3 = scmp.lt.u32.totalorder %s2681_s29, %s3174_s5 }
  0x1e   : > { %p2684_p1 = pnand %p2971_p0, %p2682_p13 }
  0x20   : > { %p2685_p2 = pneg %p2684_p1 }
  0x22   : > { %p2690_p4 = pnand %p2688_p3, %p2685_p2 }
  0x24   : > { %2693 = shalt.err (!%p2690_p4)
}
  0x25   : > { %s2694_s27 = scalar_lea.vmem %s284_s23, 12288  ;;  %p2702_p9 = scmp.lt.s32.totalorder %s284_s23, %s284_s23 }
  0x26   : > { %p2695_p7 = scmp.ne.s32.totalorder %s284_s23, %s2694_s27  ;;  %p2703_p6 = scmp.lt.s32.totalorder %s2694_s27, %s2694_s27 }
  0x28   : > { %p2697_p8 = pnand %p2695_p7, %p2971_p0  ;;  %p2704_p5 = por %p2703_p6, %p2702_p9 }
  0x2a   : > { %p2698_p11 = pneg %p2697_p8 }
  0x2c   : > { %p2705_p10 = pnand %p2704_p5, %p2698_p11 }
  0x2e   : > { %2708 = shalt.err (!%p2705_p10)
}
  0x2f   : > { %s2839_s28 = smov 256   ;;  %s2840_s14 = smov 16  }
  0x30   : > { %2410 = dma.hbm_to_vmem [thread:$0]  (!%p2957_p12), %s3174_s5, 12288, %s284_s23, [#allocation6], %s2839_s28, %s2839_s28, %s2840_s14  }
  0x31   : > { %s2709_s18 = scalar_lea.hbm %s3151_s3, 3072 }
  0x32   : > { %p2710_p13 = scmp.ne.s32.totalorder %s3151_s3, %s2709_s18  ;;  %p2716_p9 = scmp.lt.u32.totalorder %s2709_s18, %s3151_s3 }
  0x34   : > { %p2712_p5 = pnand %p2710_p13, %p2971_p0 }
  0x36   : > { %p2713_p6 = pneg %p2712_p5 }
  0x38   : > { %p2718_p10 = pnand %p2716_p9, %p2713_p6 }
  0x3a   : > { %2721 = shalt.err (!%p2718_p10)
}
  0x3b   : > { %s2722_s23 = scalar_lea.vmem %s2961_s26, 3072  ;;  %p2730_p4 = scmp.lt.s32.totalorder %s2961_s26, %s2961_s26 }
  0x3c   : > { %p2723_p1 = scmp.ne.s32.totalorder %s2961_s26, %s2722_s23  ;;  %p2731_p7 = scmp.lt.s32.totalorder %s2722_s23, %s2722_s23 }
  0x3e   : > { %p2725_p2 = pnand %p2723_p1, %p2971_p0  ;;  %p2732_p8 = por %p2731_p7, %p2730_p4 }
  0x40   : > { %p2726_p3 = pneg %p2725_p2 }
  0x42   : > { %p2733_p11 = pnand %p2732_p8, %p2726_p3 }
  0x44   : > { %2736 = shalt.err (!%p2733_p11)
}
  0x45   : > { %s2841_s11 = smov 192   ;;  %s2842_s15 = smov 12  }
  0x46   : > { %2407 = dma.hbm_to_vmem [thread:$0]  (!%p2957_p12), %s3151_s3, 3072, %s2961_s26, [#allocation3], %s2841_s11, %s2841_s11, %s2842_s15  }
  0x47   : > { %s2843_s28 = smov [#allocation7]   ;;  %s2737_s22 = scalar_lea.hbm %s3155_s7, 4096 }
  0x48   : > { %s299_s14 = sshll.u32 %s2843_s28, 4  ;;  %p2738_p13 = scmp.ne.s32.totalorder %s3155_s7, %s2737_s22  ;;  %s300_s14 = int_to_ptr.vmem [resolvable:$true] %s299_s14 }
  0x49   : > { %p2744_p9 = scmp.lt.u32.totalorder %s2737_s22, %s3155_s7 }
  0x4a   : > { %p2740_p5 = pnand %p2738_p13, %p2971_p0 }
  0x4c   : > { %p2741_p6 = pneg %p2740_p5 }
  0x4e   : > { %p2746_p10 = pnand %p2744_p9, %p2741_p6 }
  0x50   : > { %2749 = shalt.err (!%p2746_p10)
}
  0x51   : > { %s2750_s26 = scalar_lea.vmem %s300_s14, 4096  ;;  %p2758_p4 = scmp.lt.s32.totalorder %s300_s14, %s300_s14 }
  0x52   : > { %p2751_p1 = scmp.ne.s32.totalorder %s300_s14, %s2750_s26  ;;  %p2759_p7 = scmp.lt.s32.totalorder %s2750_s26, %s2750_s26 }
  0x54   : > { %p2753_p2 = pnand %p2751_p1, %p2971_p0  ;;  %p2760_p8 = por %p2759_p7, %p2758_p4 }
  0x56   : > { %p2754_p3 = pneg %p2753_p2 }
  0x58   : > { %p2761_p11 = pnand %p2760_p8, %p2754_p3 }
  0x5a   : > { %2764 = shalt.err (!%p2761_p11)
}
  0x5b   : > { %s2844_s11 = smov 64   ;;  %s2845_s15 = smov 4  }
  0x5c   : > { %2413 = dma.hbm_to_vmem [thread:$0]  (!%p2957_p12), %s3155_s7, 4096, %s300_s14, [#allocation6], %s2844_s11, %s2844_s11, %s2845_s15  }
  0x5d   : > { %p3176_p13 = scmp.ne.s32.totalorder %s3172_s21, 0 }
  0x5e   : > { %p3177_p5 = scmp.eq.s32.totalorder (!%p3176_p13), %s2921_s13, 0 }
  0x5f   : > { %327 = sbr.rel (%p3176_p13) target bundleno = 1057 (0x421), region = 56 }
  0x66   : > { %2810 = dma.done.wait (%p3177_p5), [#allocation3], 3072   ;;  %p3178_p0 = pmov %p3177_p5 }
  0x68   : > { %2812 = vsyncadd (%p3178_p0), [#allocation3], 4294964224  ;;  %p3179_p6 = pmov %p3178_p0 }
  0x69   : > { %p3180_p9 = pmov %p3178_p0 }
  0x6a   : > { %2814 = dma.done.wait (%p3179_p6), [#allocation6], 16384  }
  0x6b   : > { %2816 = vsyncadd (%p3180_p9), [#allocation6], 4294950912  ;;  %s2092_s24 = sshll.u32 %s2921_s13, 2  ;;  %v2469_v0 = vld [vmem:[%s3149_s1] sm:$0xff]   ;;  %v2470_v1 = vld [vmem:[%s3149_s1 + $0x8] sm:$0xff]   ;;  %vm416_vm0 = vcmask 261120  }
  0x6c   : > { %p372_p10 = scmp.lt.s32.totalorder %s2092_s24, 7  ;;  %2330 = vmatprep.subr.bf16.mxu0 %v2469_v0  ;;  %v2473_v4 = vld [vmem:[#allocation2 + $0x4] ss:$12 sps:$4 sm:$0xff]   ;;  %v2475_v5 = vld [vmem:[#allocation2] ss:$12 sps:$4 sm:$0xff]   ;;  %v2846_v28 = vmov 0  }
  0x6d   : > { %2331 = vmatpush3.bf16.msra.mxu0 %v2469_v0  ;;  %655 = vmatprep.subr.bf16.mxu1 %v2473_v4  ;;  %v2476_v6 = vld [vmem:[#allocation2 + $0x8] ss:$12 sps:$4 sm:$0xff]   ;;  %v2479_v8 = vld [vmem:[#allocation2 + $0x18] ss:$12 sps:$4 sm:$0xff]   ;;  %v2480_v9 = vld [vmem:[#allocation2 + $0x20] ss:$12 sps:$4 sm:$0xff]  }
  0x6e   : > { %s3190_s24 = smov (!%p372_p10, %s2092_s24), 7  ;;  %2332 = vmatprep.subr.bf16.mxu0 %v2470_v1  ;;  %656 = vmatpush1.bf16.msra.mxu1 %v2475_v5  ;;  %v2477_v7 = vld [vmem:[#allocation2 + $0x1c] ss:$12 sps:$4 sm:$0xff]   ;;  %v2481_v10 = vld [vmem:[#allocation2 + $0x34] ss:$12 sps:$4 sm:$0xff]   ;;  %s368_s18 = sand.u32 1, %s2827_s10  }
  0x6f   : > { %s2093_s17 = sshll.u32 %s3190_s24, 2  ;;  %657 = vmatprep.subr.bf16.mxu1 %v2477_v7  ;;  %v2483_v11 = vld [vmem:[#allocation2 + $0x30] ss:$12 sps:$4 sm:$0xff]   ;;  %v2484_v12 = vld [vmem:[#allocation2 + $0x38] ss:$12 sps:$4 sm:$0xff]   ;;  %687 = vmatprep.mubr.bf16.mxu1 %v2846_v28  ;;  %s3107_s22 = scalar_lea.sflag [#allocation4], %s368_s18 }
  0x70   : > { %s375_s28 = scalar_lea.vmem %s3148_s0, %s2093_s17  ;;  %v2485_v13 = vld [vmem:[#allocation2 + $0x4c] ss:$12 sps:$4 sm:$0xff]   ;;  %v2487_v14 = vld [vmem:[#allocation2 + $0x48] ss:$12 sps:$4 sm:$0xff]   ;;  %v2488_v15 = vld [vmem:[#allocation2 + $0x50] ss:$12 sps:$4 sm:$0xff]  }
  0x71   : > { %v2471_v2 = vld [vmem:[%s375_s28] sm:$0xff]   ;;  %v2472_v3 = vld [vmem:[%s375_s28 + $0x8] sm:$0xff]   ;;  %2333 = vmatpush3.bf16.msra.mxu0 %v2470_v1  ;;  %v2491_v17 = vld [vmem:[#allocation2 + $0x60] ss:$12 sps:$4 sm:$0xff]   ;;  %s2091_s17 = sshll.u32 %s368_s18, 5  ;;  %s2259_s28 = sshll.u32 %s2921_s13, 9 }
  0x72   : > { %2334 = vmatprep.mubr.msk.bf16.mxu0 %vm416_vm0, %v2471_v2  ;;  %2338 = vmatprep.subr.bf16.mxu0 %v2476_v6  ;;  %v2489_v16 = vld [vmem:[#allocation2 + $0x64] ss:$12 sps:$4 sm:$0xff]   ;;  %v2492_v18 = vld [vmem:[#allocation2 + $0x68] ss:$12 sps:$4 sm:$0xff]   ;;  %v2496_v21 = vld [vmem:[#allocation2 + $0x80] ss:$12 sps:$4 sm:$0xff]   ;;  %s3103_s29 = scalar_lea.hbm %s3157_s9, %s2259_s28 }
  0x73   : > { %658 = vmatpush1.bf16.msra.mxu1 %v2479_v8  ;;  %v2493_v19 = vld [vmem:[#allocation2 + $0x7c] ss:$12 sps:$4 sm:$0xff]   ;;  %v2495_v20 = vld [vmem:[#allocation2 + $0x78] ss:$12 sps:$4 sm:$0xff]   ;;  %v2497_v22 = vld [vmem:[#allocation2 + $0x94] ss:$12 sps:$4 sm:$0xff]  }
  0x74   : > { %2335 = vmatmul.mubr.msk.bf16.vlgmr.msra.gmra.mrb[0].mxu0 %vm416_vm0, %v2472_v3  ;;  %659 = vmatprep.subr.bf16.mxu1 %v2481_v10  ;;  %v2499_v23 = vld [vmem:[#allocation2 + $0x90] ss:$12 sps:$4 sm:$0xff]   ;;  %v2500_v24 = vld [vmem:[#allocation2 + $0x98] ss:$12 sps:$4 sm:$0xff]   ;;  %v2503_v26 = vld [vmem:[#allocation2 + $0xa8] ss:$12 sps:$4 sm:$0xff]  }
  0x75   : > { %2339 = vmatpush3.bf16.msra.mxu0 %v2476_v6  ;;  %v2501_v25 = vld [vmem:[#allocation2 + $0xac] ss:$12 sps:$4 sm:$0xff]   ;;  %v2504_v27 = vld [vmem:[#allocation2 + $0xb0] ss:$12 sps:$4 sm:$0xff]   ;;  %v2507_v29 = vld [vmem:[#allocation5 + $0x4] ss:$16 sps:$4 sm:$0xff]  }
  0x76   : > { %2340 = vmatprep.subr.bf16.mxu0 %v2480_v9  ;;  %v2510_v30 = vld [vmem:[#allocation5 + $0xc] ss:$16 sps:$4 sm:$0xff]   ;;  %v2094_v31 = vld [vmem:[%s3150_s2] ss:$0 sm:$0xff]  ;;  %v2508_v47 = vld [vmem:[#allocation5 + $0x8] ss:$16 sps:$4 sm:$0xff]  }
  0x77   : > { %660 = vmatpush1.bf16.msra.mxu1 %v2483_v11  ;;  %v2505_v46 = vld [vmem:[#allocation5] ss:$16 sps:$4 sm:$0xff]   ;;  %v2513_v48 = vld [vmem:[#allocation5 + $0x24] ss:$16 sps:$4 sm:$0xff]   ;;  %v2516_v49 = vld [vmem:[#allocation5 + $0x2c] ss:$16 sps:$4 sm:$0xff]  }
  0x78   : > { %661 = vmatprep.subr.bf16.mxu1 %v2485_v13  ;;  %v2511_v50 = vld [vmem:[#allocation5 + $0x20] ss:$16 sps:$4 sm:$0xff]   ;;  %v2514_v51 = vld [vmem:[#allocation5 + $0x28] ss:$16 sps:$4 sm:$0xff]   ;;  %v2519_v52 = vld [vmem:[#allocation5 + $0x44] ss:$16 sps:$4 sm:$0xff]  }
  0x79   : > { %2341 = vmatpush3.bf16.msra.mxu0 %v2480_v9  ;;  %v2522_v53 = vld [vmem:[#allocation5 + $0x4c] ss:$16 sps:$4 sm:$0xff]   ;;  %v2517_v54 = vld [vmem:[#allocation5 + $0x40] ss:$16 sps:$4 sm:$0xff]   ;;  %v2520_v55 = vld [vmem:[#allocation5 + $0x48] ss:$16 sps:$4 sm:$0xff]  }
  0x7a   : > { %2342 = vmatprep.subr.bf16.mxu0 %v2484_v12  ;;  %v2525_v56 = vld [vmem:[#allocation5 + $0x64] ss:$16 sps:$4 sm:$0xff]   ;;  %v2528_v57 = vld [vmem:[#allocation5 + $0x6c] ss:$16 sps:$4 sm:$0xff]   ;;  %v2523_v58 = vld [vmem:[#allocation5 + $0x60] ss:$16 sps:$4 sm:$0xff]  }
  0x7b   : > { %662 = vmatpush1.bf16.msra.mxu1 %v2487_v14  ;;  %v2526_v59 = vld [vmem:[#allocation5 + $0x68] ss:$16 sps:$4 sm:$0xff]   ;;  %v2531_v60 = vld [vmem:[#allocation5 + $0x84] ss:$16 sps:$4 sm:$0xff]   ;;  %v2534_v61 = vld [vmem:[#allocation5 + $0x8c] ss:$16 sps:$4 sm:$0xff]  }
  0x7c   : > { %663 = vmatprep.subr.bf16.mxu1 %v2489_v16  ;;  %v2529_v62 = vld [vmem:[#allocation5 + $0x80] ss:$16 sps:$4 sm:$0xff]   ;;  %v2532_v63 = vld [vmem:[#allocation5 + $0x88] ss:$16 sps:$4 sm:$0xff]   ;;  %v2537_v0 = vld [vmem:[#allocation5 + $0xa4] ss:$16 sps:$4 sm:$0xff]  }
  0x7d   : > { %2343 = vmatpush3.bf16.msra.mxu0 %v2484_v12  ;;  %v2540_v1 = vld [vmem:[#allocation5 + $0xac] ss:$16 sps:$4 sm:$0xff]   ;;  %v2535_v2 = vld [vmem:[#allocation5 + $0xa0] ss:$16 sps:$4 sm:$0xff]   ;;  %v2538_v3 = vld [vmem:[#allocation5 + $0xa8] ss:$16 sps:$4 sm:$0xff]  }
  0x7e   : > { %2344 = vmatprep.subr.bf16.mxu0 %v2488_v15  ;;  %v2543_v4 = vld [vmem:[#allocation5 + $0xc4] ss:$16 sps:$4 sm:$0xff]   ;;  %v2546_v5 = vld [vmem:[#allocation5 + $0xcc] ss:$16 sps:$4 sm:$0xff]   ;;  %v2541_v6 = vld [vmem:[#allocation5 + $0xc0] ss:$16 sps:$4 sm:$0xff]  }
  0x7f   : > { %664 = vmatpush1.bf16.msra.mxu1 %v2491_v17  ;;  %v2544_v7 = vld [vmem:[#allocation5 + $0xc8] ss:$16 sps:$4 sm:$0xff]   ;;  %v2549_v8 = vld [vmem:[#allocation5 + $0xe4] ss:$16 sps:$4 sm:$0xff]   ;;  %v2552_v9 = vld [vmem:[#allocation5 + $0xec] ss:$16 sps:$4 sm:$0xff]  }
  0x80   : > { %665 = vmatprep.subr.bf16.mxu1 %v2493_v19  ;;  %v2547_v10 = vld [vmem:[#allocation5 + $0xe0] ss:$16 sps:$4 sm:$0xff]   ;;  %v2550_v11 = vld [vmem:[#allocation5 + $0xe8] ss:$16 sps:$4 sm:$0xff]   ;;  %v2555_v12 = vld [vmem:[#allocation5 + $0x104] ss:$16 sps:$4 sm:$0xff]  }
  0x81   : > { %2345 = vmatpush3.bf16.msra.mxu0 %v2488_v15  ;;  %v2558_v13 = vld [vmem:[#allocation5 + $0x10c] ss:$16 sps:$4 sm:$0xff]   ;;  %v2553_v14 = vld [vmem:[#allocation5 + $0x100] ss:$16 sps:$4 sm:$0xff]   ;;  %v2556_v15 = vld [vmem:[#allocation5 + $0x108] ss:$16 sps:$4 sm:$0xff]  }
  0x82   : > { %2346 = vmatprep.subr.bf16.mxu0 %v2492_v18  ;;  %v2561_v16 = vld [vmem:[#allocation5 + $0x124] ss:$16 sps:$4 sm:$0xff]   ;;  %v2564_v17 = vld [vmem:[#allocation5 + $0x12c] ss:$16 sps:$4 sm:$0xff]   ;;  %v2562_v19 = vld [vmem:[#allocation5 + $0x128] ss:$16 sps:$4 sm:$0xff]  }
  0x83   : > { %666 = vmatpush1.bf16.msra.mxu1 %v2495_v20  ;;  %v2567_v20 = vld [vmem:[#allocation5 + $0x144] ss:$16 sps:$4 sm:$0xff]   ;;  %s370_s20 = scalar_lea.vmem [#allocation8], %s2091_s17  ;;  %p3181_p1 = scmp.ne.s32.totalorder %s3169_s19, 0 }
  0x84   : > { %667 = vmatprep.subr.bf16.mxu1 %v2497_v22  ;;  %v2565_v22 = vld [vmem:[#allocation5 + $0x140] ss:$16 sps:$4 sm:$0xff]   ;;  %s1988_s21 = sshll.u32 %s370_s20, 4  ;;  %s2847_s13 = smov [#allocation8]   ;;  %s3098_s21 = int_to_ptr.vmem [resolvable:$true] %s1988_s21 }
  0x85   : > { %2347 = vmatpush3.bf16.msra.mxu0 %v2492_v18  ;;  %v2559_v18 = vld [vmem:[#allocation5 + $0x120] ss:$16 sps:$4 sm:$0xff]   ;;  %s2765_s25 = scalar_lea.vmem %s3098_s21, 512  ;;  %s2769_s27 = sshll.u32 %s2847_s13, 4  ;;  %s2770_s27 = int_to_ptr.vmem [resolvable:$false] %s2769_s27 }
  0x86   : > { %2348 = vmatprep.subr.bf16.mxu0 %v2496_v21  ;;  %p2766_p12 = scmp.ne.s32.totalorder %s3098_s21, %s2765_s25  ;;  %s2771_s23 = scalar_lea.vmem %s2770_s27, 1024 }
  0x87   : > { %668 = vmatpush1.bf16.msra.mxu1 %v2499_v23  ;;  %v2568_v23 = vld [vmem:[#allocation5 + $0x148] ss:$16 sps:$4 sm:$0xff]   ;;  %p2772_p4 = scmp.lt.s32.totalorder %s3098_s21, %s2770_s27  ;;  %p2773_p7 = scmp.lt.s32.totalorder %s2771_s23, %s2765_s25 }
  0x88   : > { %669 = vmatprep.subr.bf16.mxu1 %v2501_v25  ;;  %v2576_v25 = vld [vmem:[#allocation5 + $0x16c] ss:$16 sps:$4 sm:$0xff]   ;;  %p2767_p2 = pnand %p2766_p12, %p3181_p1 }
  0x89   : > { %2349 = vmatpush3.bf16.msra.mxu0 %v2496_v21  ;;  %v2570_v21 = vld [vmem:[#allocation5 + $0x14c] ss:$16 sps:$4 sm:$0xff]   ;;  %p2774_p8 = por %p2773_p7, %p2772_p4 }
  0x8a   : > { %2350 = vmatprep.subr.bf16.mxu0 %v2500_v24  ;;  %p2768_p3 = pneg %p2767_p2 }
  0x8b   : > { %670 = vmatpush1.bf16.msra.mxu1 %v2503_v26  ;;  %v2571_v26 = vld [vmem:[#allocation5 + $0x160] ss:$16 sps:$4 sm:$0xff]  }
  0x8c   : > { %1373 = vmatprep.subr.bf16.mxu1 %v2507_v29  ;;  %v2579_v29 = vld [vmem:[#allocation5 + $0x184] ss:$16 sps:$4 sm:$0xff]   ;;  %p2775_p11 = pnand %p2774_p8, %p2768_p3 }
  0x8d   : > { %2351 = vmatpush3.bf16.msra.mxu0 %v2500_v24  ;;  %v2573_v24 = vld [vmem:[#allocation5 + $0x164] ss:$16 sps:$4 sm:$0xff]  }
  0x8e   : > { %2352 = vmatprep.subr.bf16.mxu0 %v2504_v27 }
  0x91   : > { %2353 = vmatpush3.bf16.msra.mxu0 %v2504_v27  ;;  %v2574_v27 = vld [vmem:[#allocation5 + $0x168] ss:$16 sps:$4 sm:$0xff]  }
  0x92   : > { %1479 = vmatprep.subr.bf16.mxu0 %v2510_v30  ;;  %v2582_v30 = vld [vmem:[#allocation5 + $0x18c] ss:$16 sps:$4 sm:$0xff]  }
 0x147   : > { %v2336_v32 = vpop.f32.mrb[0].mxu0 }
 0x148   : > { %v466_v33 = vadd.f32 %v2336_v32, %v2094_v31  ;;  %v457_v34 = vpop.f32.mrb[1].mxu0  ;;  %v2580_v32 = vld [vmem:[#allocation5 + $0x188] ss:$16 sps:$4 sm:$0xff]  }
 0x149   : > { %v458_v35 = vadd.f32 %v2094_v31, %v457_v34  ;;  %v2337_v36 = vpop.f32.mrb[2].mxu0  ;;  %v2588_v34 = vld [vmem:[#allocation5 + $0x1ac] ss:$16 sps:$4 sm:$0xff]  }
 0x14a   : > { %v469_v37 = vadd.f32 %v2337_v36, %v2094_v31  ;;  %v460_v38 = vpop.f32.mrb[3].mxu0  ;;  %v474_v40 = vmax.f32 %v466_v33, 0.0  ;;  %v2585_v33 = vld [vmem:[#allocation5 + $0x1a4] ss:$16 sps:$4 sm:$0xff]   ;;  %v2586_v36 = vld [vmem:[#allocation5 + $0x1a8] ss:$16 sps:$4 sm:$0xff]  }
 0x14b   : > { %v461_v39 = vadd.f32 %v2094_v31, %v460_v38  ;;  %v472_v42 = vmax.f32 %v458_v35, 0.0  ;;  %v2577_v31 = vld [vmem:[#allocation5 + $0x180] ss:$16 sps:$4 sm:$0xff]   ;;  %v2594_v38 = vld [vmem:[#allocation5 + $0x1cc] ss:$16 sps:$4 sm:$0xff]  }
 0x14c   : > { %v475_v41 = vmax.f32 %v469_v37, 0.0  ;;  %v2583_v35 = vld [vmem:[#allocation5 + $0x1a0] ss:$16 sps:$4 sm:$0xff]   ;;  %v2591_v37 = vld [vmem:[#allocation5 + $0x1c4] ss:$16 sps:$4 sm:$0xff]  }
 0x14d   : > { %v473_v43 = vmax.f32 %v461_v39, 0.0  ;;  %v2589_v39 = vld [vmem:[#allocation5 + $0x1c0] ss:$16 sps:$4 sm:$0xff]  }
 0x14e   : > { %v477_v44 = vpack.c.bf16 %v475_v41, %v474_v40  ;;  %v2592_v40 = vld [vmem:[#allocation5 + $0x1c8] ss:$16 sps:$4 sm:$0xff]   ;;  %v2597_v41 = vld [vmem:[#allocation5 + $0x1e4] ss:$16 sps:$4 sm:$0xff]  }
 0x14f   : > { %v476_v45 = vpack.c.bf16 %v473_v43, %v472_v42  ;;  %v2600_v42 = vld [vmem:[#allocation5 + $0x1ec] ss:$16 sps:$4 sm:$0xff]   ;;  %v2595_v43 = vld [vmem:[#allocation5 + $0x1e0] ss:$16 sps:$4 sm:$0xff]  }
 0x151   : > { %688 = vmatmul.mubr.bf16.vlgmr.msra.gmra.mrb[0].mxu1 %v476_v45  ;;  %2354 = vmatprep.mubr.bf16.mxu0 %v476_v45  ;;  %v2603_v45 = vld [vmem:[#allocation5 + $0x204] ss:$16 sps:$4 sm:$0xff]  }
 0x152   : > { %2355 = vmatmul.mubr.bf16.vlgmr.msra.gmra.mrb[4].mxu0 %v477_v44  ;;  %697 = vmatprep.mubr.bf16.mxu1 %v2846_v28 }
 0x153   : > { %1374 = vmatpush1.bf16.msra.mxu1 %v2505_v46  ;;  %1480 = vmatpush1.bf16.msra.mxu0 %v2508_v47  ;;  %v2606_v46 = vld [vmem:[#allocation5 + $0x20c] ss:$16 sps:$4 sm:$0xff]   ;;  %v512_v47 = vlaneseq }
 0x154   : > { %1375 = vmatprep.subr.bf16.mxu1 %v2513_v48  ;;  %1481 = vmatprep.subr.bf16.mxu0 %v2516_v49 }
 0x155   : > { %v3055_v48 = vshrl.u32 %v512_v47, 7  ;;  %v2619_v47 = vld [vmem:[#allocation5 + $0x260] ss:$16 sps:$4 sm:$0xff]  }
 0x157   : > { %1376 = vmatpush1.bf16.msra.mxu1 %v2511_v50  ;;  %1482 = vmatpush1.bf16.msra.mxu0 %v2514_v51  ;;  %v514_v49 = vsub.s32 0, %v3055_v48  ;;  %v510_v50 = vld [vmem:[%s3152_s4] sm:$0x7]  ;;  %v518_v51 = vsub.s32 1, %v3055_v48 }
 0x158   : > { %1377 = vmatprep.subr.bf16.mxu1 %v2519_v52  ;;  %1483 = vmatprep.subr.bf16.mxu0 %v2522_v53  ;;  %v522_v52 = vsub.s32 2, %v3055_v48 }
 0x159   : > { %698 = vmatmul.mubr.bf16.gmra.mrb[4].mxu1 %v477_v44  ;;  %v2598_v44 = vld [vmem:[#allocation5 + $0x1e8] ss:$16 sps:$4 sm:$0xff]   ;;  %v515_v53 = vrot.slane %v510_v50, %v514_v49 }
 0x15b   : > { %1378 = vmatpush1.bf16.msra.mxu1 %v2517_v54  ;;  %1484 = vmatpush1.bf16.msra.mxu0 %v2520_v55  ;;  %v519_v54 = vrot.slane %v510_v50, %v518_v51  ;;  %v523_v55 = vrot.slane %v510_v50, %v522_v52  ;;  %v2622_v50 = vld [vmem:[#allocation5 + $0x268] ss:$16 sps:$4 sm:$0xff]  }
 0x15c   : > { %1379 = vmatprep.subr.bf16.mxu1 %v2525_v56  ;;  %1485 = vmatprep.subr.bf16.mxu0 %v2528_v57 }
 0x15f   : > { %1380 = vmatpush1.bf16.msra.mxu1 %v2523_v58  ;;  %1486 = vmatpush1.bf16.msra.mxu0 %v2526_v59 }
 0x160   : > { %1381 = vmatprep.subr.bf16.mxu1 %v2531_v60  ;;  %1487 = vmatprep.subr.bf16.mxu0 %v2534_v61 }
 0x163   : > { %1382 = vmatpush1.bf16.msra.mxu1 %v2529_v62  ;;  %1488 = vmatpush1.bf16.msra.mxu0 %v2532_v63 }
 0x164   : > { %1383 = vmatprep.subr.bf16.mxu1 %v2537_v0  ;;  %1489 = vmatprep.subr.bf16.mxu0 %v2540_v1 }
 0x167   : > { %1384 = vmatpush1.bf16.msra.mxu1 %v2535_v2  ;;  %1490 = vmatpush1.bf16.msra.mxu0 %v2538_v3 }
 0x168   : > { %1385 = vmatprep.subr.bf16.mxu1 %v2543_v4  ;;  %1491 = vmatprep.subr.bf16.mxu0 %v2546_v5 }
 0x16b   : > { %1386 = vmatpush1.bf16.msra.mxu1 %v2541_v6  ;;  %1492 = vmatpush1.bf16.msra.mxu0 %v2544_v7 }
 0x16c   : > { %1387 = vmatprep.subr.bf16.mxu1 %v2549_v8  ;;  %1493 = vmatprep.subr.bf16.mxu0 %v2552_v9 }
 0x16f   : > { %1388 = vmatpush1.bf16.msra.mxu1 %v2547_v10  ;;  %1494 = vmatpush1.bf16.msra.mxu0 %v2550_v11 }
 0x170   : > { %1389 = vmatprep.subr.bf16.mxu1 %v2555_v12  ;;  %1495 = vmatprep.subr.bf16.mxu0 %v2558_v13 }
 0x173   : > { %1390 = vmatpush1.bf16.msra.mxu1 %v2553_v14  ;;  %1496 = vmatpush1.bf16.msra.mxu0 %v2556_v15 }
 0x174   : > { %1391 = vmatprep.subr.bf16.mxu1 %v2561_v16  ;;  %1497 = vmatprep.subr.bf16.mxu0 %v2564_v17 }
 0x177   : > { %1392 = vmatpush1.bf16.msra.mxu1 %v2559_v18  ;;  %1498 = vmatpush1.bf16.msra.mxu0 %v2562_v19 }
 0x178   : > { %1393 = vmatprep.subr.bf16.mxu1 %v2567_v20  ;;  %1499 = vmatprep.subr.bf16.mxu0 %v2570_v21  ;;  %v2601_v20 = vld [vmem:[#allocation5 + $0x200] ss:$16 sps:$4 sm:$0xff]   ;;  %v2604_v21 = vld [vmem:[#allocation5 + $0x208] ss:$16 sps:$4 sm:$0xff]  }
 0x17b   : > { %1394 = vmatpush1.bf16.msra.mxu1 %v2565_v22  ;;  %1500 = vmatpush1.bf16.msra.mxu0 %v2568_v23 }
 0x17c   : > { %1395 = vmatprep.subr.bf16.mxu1 %v2573_v24  ;;  %1501 = vmatprep.subr.bf16.mxu0 %v2576_v25  ;;  %v2609_v25 = vld [vmem:[#allocation5 + $0x224] ss:$16 sps:$4 sm:$0xff]  }
 0x17f   : > { %1396 = vmatpush1.bf16.msra.mxu1 %v2571_v26  ;;  %1502 = vmatpush1.bf16.msra.mxu0 %v2574_v27  ;;  %v2612_v26 = vld [vmem:[#allocation5 + $0x22c] ss:$16 sps:$4 sm:$0xff]  }
 0x180   : > { %1397 = vmatprep.subr.bf16.mxu1 %v2579_v29  ;;  %1503 = vmatprep.subr.bf16.mxu0 %v2582_v30 }
 0x183   : > { %1398 = vmatpush1.bf16.msra.mxu1 %v2577_v31  ;;  %1504 = vmatpush1.bf16.msra.mxu0 %v2580_v32 }
 0x184   : > { %1399 = vmatprep.subr.bf16.mxu1 %v2585_v33  ;;  %1505 = vmatprep.subr.bf16.mxu0 %v2588_v34  ;;  %v2607_v33 = vld [vmem:[#allocation5 + $0x220] ss:$16 sps:$4 sm:$0xff]   ;;  %v2610_v34 = vld [vmem:[#allocation5 + $0x228] ss:$16 sps:$4 sm:$0xff]  }
 0x187   : > { %1400 = vmatpush1.bf16.msra.mxu1 %v2583_v35  ;;  %1506 = vmatpush1.bf16.msra.mxu0 %v2586_v36 }
 0x188   : > { %1401 = vmatprep.subr.bf16.mxu1 %v2591_v37  ;;  %1507 = vmatprep.subr.bf16.mxu0 %v2594_v38  ;;  %v2615_v37 = vld [vmem:[#allocation5 + $0x244] ss:$16 sps:$4 sm:$0xff]   ;;  %v2618_v38 = vld [vmem:[#allocation5 + $0x24c] ss:$16 sps:$4 sm:$0xff]  }
 0x18b   : > { %1402 = vmatpush1.bf16.msra.mxu1 %v2589_v39  ;;  %1508 = vmatpush1.bf16.msra.mxu0 %v2592_v40 }
 0x18c   : > { %1403 = vmatprep.subr.bf16.mxu1 %v2597_v41  ;;  %1509 = vmatprep.subr.bf16.mxu0 %v2600_v42 }
 0x18f   : > { %1404 = vmatpush1.bf16.msra.mxu1 %v2595_v43  ;;  %1510 = vmatpush1.bf16.msra.mxu0 %v2598_v44  ;;  %v2613_v43 = vld [vmem:[#allocation5 + $0x240] ss:$16 sps:$4 sm:$0xff]   ;;  %v2616_v44 = vld [vmem:[#allocation5 + $0x248] ss:$16 sps:$4 sm:$0xff]  }
 0x190   : > { %1426 = vmatprep.subr.bf16.mxu1 %v2603_v45  ;;  %1532 = vmatprep.subr.bf16.mxu0 %v2606_v46  ;;  %v2621_v45 = vld [vmem:[#allocation5 + $0x264] ss:$16 sps:$4 sm:$0xff]   ;;  %v2624_v46 = vld [vmem:[#allocation5 + $0x26c] ss:$16 sps:$4 sm:$0xff]  }
 0x224   : > { %v689_v56 = vpop.f32.mrb[0].mxu1 }
 0x225   : > { %v690_v57 = vadd.f32 %v689_v56, %v515_v53  ;;  %v691_v58 = vpop.f32.mrb[1].mxu1  ;;  %v2356_v59 = vpop.f32.mrb[4].mxu0  ;;  %v2628_v56 = vld [vmem:[#allocation5 + $0x288] ss:$16 sps:$4 sm:$0xff]  }
 0x226   : > { %v692_v60 = vadd.f32 %v691_v58, %v519_v54  ;;  %v751_v61 = vadd.f32 %v2356_v59, %v523_v55  ;;  %v693_v62 = vpop.f32.mrb[2].mxu1  ;;  %v742_v63 = vpop.f32.mrb[5].mxu0  ;;  %v2636_v58 = vld [vmem:[#allocation5 + $0x2ac] ss:$16 sps:$4 sm:$0xff]   ;;  %v2631_v59 = vld [vmem:[#allocation5 + $0x2a0] ss:$16 sps:$4 sm:$0xff]  }
 0x227   : > { %v694_v0 = vadd.f32 %v693_v62, %v515_v53  ;;  %v743_v1 = vadd.f32 %v742_v63, %v523_v55  ;;  %v695_v2 = vpop.f32.mrb[3].mxu1  ;;  %v2357_v3 = vpop.f32.mrb[6].mxu0  ;;  %v757_v7 = vmax.f32 %v690_v57, 0.0  ;;  %v2633_v57 = vld [vmem:[#allocation5 + $0x2a4] ss:$16 sps:$4 sm:$0xff]  }
 0x228   : > { %v696_v4 = vadd.f32 %v695_v2, %v519_v54  ;;  %v754_v5 = vadd.f32 %v2357_v3, %v523_v55  ;;  %v745_v6 = vpop.f32.mrb[7].mxu0  ;;  %v758_v10 = vmax.f32 %v692_v60, 0.0  ;;  %v765_v11 = vmax.f32 %v751_v61, 0.0  ;;  %v2634_v60 = vld [vmem:[#allocation5 + $0x2a8] ss:$16 sps:$4 sm:$0xff]  }
 0x229   : > { %v760_v8 = vmax.f32 %v694_v0, 0.0  ;;  %v746_v9 = vadd.f32 %v745_v6, %v523_v55  ;;  %v759_v15 = vmax.f32 %v743_v1, 0.0  ;;  %v2625_v55 = vld [vmem:[#allocation5 + $0x280] ss:$16 sps:$4 sm:$0xff]   ;;  %v2639_v61 = vld [vmem:[#allocation5 + $0x2c4] ss:$16 sps:$4 sm:$0xff]  }
 0x22a   : > { %v761_v12 = vmax.f32 %v696_v4, 0.0  ;;  %v768_v13 = vmax.f32 %v754_v5, 0.0  ;;  %v2642_v62 = vld [vmem:[#allocation5 + $0x2cc] ss:$16 sps:$4 sm:$0xff]   ;;  %v2637_v63 = vld [vmem:[#allocation5 + $0x2c0] ss:$16 sps:$4 sm:$0xff]  }
 0x22b   : > { %v769_v14 = vpack.c.bf16 %v760_v8, %v757_v7  ;;  %v762_v16 = vmax.f32 %v746_v9, 0.0  ;;  %v2640_v0 = vld [vmem:[#allocation5 + $0x2c8] ss:$16 sps:$4 sm:$0xff]   ;;  %v2645_v1 = vld [vmem:[#allocation5 + $0x2e4] ss:$16 sps:$4 sm:$0xff]  }
 0x22c   : > { %v770_v17 = vpack.c.bf16 %v761_v12, %v758_v10  ;;  %v3069_v18 = vpack.c.bf16 %v768_v13, %v765_v11  ;;  %v699_v19 = vpop.f32.mrb[4].mxu1  ;;  %v2648_v2 = vld [vmem:[#allocation5 + $0x2ec] ss:$16 sps:$4 sm:$0xff]   ;;  %v2643_v3 = vld [vmem:[#allocation5 + $0x2e0] ss:$16 sps:$4 sm:$0xff]  }
 0x22d   : > { %v3071_v22 = vpack.c.bf16 %v762_v16, %v759_v15  ;;  %v700_v23 = vadd.f32 %v699_v19, %v515_v53  ;;  %v701_v24 = vpop.f32.mrb[5].mxu1  ;;  %v2646_v4 = vld [vmem:[#allocation5 + $0x2e8] ss:$16 sps:$4 sm:$0xff]   ;;  %v2649_v5 = vld [vmem:[#allocation7 + $0x40] sm:$0xff]   ;;  %v2657_v13 = vld [vmem:[#allocation7 + $0x50] sm:$0xff]  }
 0x22e   : > { %v702_v27 = vadd.f32 %v701_v24, %v519_v54  ;;  %v703_v29 = vpop.f32.mrb[6].mxu1  ;;  %1405 = vmatprep.mubr.bf16.mxu1 %v770_v17  ;;  %1511 = vmatprep.mubr.bf16.mxu0 %v770_v17  ;;  %v2650_v6 = vld [vmem:[#allocation7 + $0xc0] sm:$0xff]   ;;  %v2653_v9 = vld [vmem:[#allocation7 + $0x48] sm:$0xff]   ;;  %v2659_v15 = vld [vmem:[#allocation7 + $0x10] sm:$0xff]  }
 0x22f   : > { %v704_v30 = vadd.f32 %v703_v29, %v515_v53  ;;  %v705_v31 = vpop.f32.mrb[7].mxu1  ;;  %1406 = vmatmul.mubr.bf16.vlgmr.msra.gmra.mrb[8].mxu1 %v769_v14  ;;  %1512 = vmatmul.mubr.bf16.vlgmr.msra.gmra.mrb[8].mxu0 %v769_v14  ;;  %v763_v35 = vmax.f32 %v700_v23, 0.0  ;;  %v2627_v53 = vld [vmem:[#allocation5 + $0x284] ss:$16 sps:$4 sm:$0xff]   ;;  %v2654_v10 = vld [vmem:[#allocation7 + $0xc8] sm:$0xff]   ;;  %v2661_v17 = vld [vmem:[#allocation7 + $0x58] sm:$0xff]  }
 0x230   : > { %v706_v32 = vadd.f32 %v705_v31, %v519_v54  ;;  %1427 = vmatpush1.bf16.msra.mxu1 %v2601_v20  ;;  %1533 = vmatpush1.bf16.msra.mxu0 %v2604_v21  ;;  %v764_v39 = vmax.f32 %v702_v27, 0.0  ;;  %v2630_v54 = vld [vmem:[#allocation5 + $0x28c] ss:$16 sps:$4 sm:$0xff]   ;;  %v2651_v7 = vld [vmem:[#allocation7] sm:$0xff]   ;;  %v2658_v14 = vld [vmem:[#allocation7 + $0xd0] sm:$0xff]  }
 0x231   : > { %v766_v36 = vmax.f32 %v704_v30, 0.0  ;;  %1428 = vmatprep.subr.bf16.mxu1 %v2609_v25  ;;  %1534 = vmatprep.subr.bf16.mxu0 %v2612_v26  ;;  %v2652_v8 = vld [vmem:[#allocation7 + $0x80] sm:$0xff]   ;;  %v2655_v11 = vld [vmem:[#allocation7 + $0x8] sm:$0xff]   ;;  %v2660_v16 = vld [vmem:[#allocation7 + $0x90] sm:$0xff]  }
 0x232   : > { %v767_v40 = vmax.f32 %v706_v32, 0.0  ;;  %v2656_v12 = vld [vmem:[#allocation7 + $0x88] sm:$0xff]   ;;  %v2662_v19 = vld [vmem:[#allocation7 + $0xd8] sm:$0xff]   ;;  %v2665_v21 = vld [vmem:[#allocation7 + $0x60] sm:$0xff]  }
 0x233   : > { %v772_v41 = vpack.c.bf16 %v766_v36, %v763_v35  ;;  %v2664_v20 = vld [vmem:[#allocation7 + $0x98] sm:$0xff]   ;;  %v2667_v23 = vld [vmem:[#allocation7 + $0x20] sm:$0xff]   ;;  %v2669_v25 = vld [vmem:[#allocation7 + $0x68] sm:$0xff]  }
 0x234   : > { %v773_v42 = vpack.c.bf16 %v767_v40, %v764_v39  ;;  %1429 = vmatpush1.bf16.msra.mxu1 %v2607_v33  ;;  %1535 = vmatpush1.bf16.msra.mxu0 %v2610_v34  ;;  %v2668_v24 = vld [vmem:[#allocation7 + $0xa0] sm:$0xff]   ;;  %v2670_v26 = vld [vmem:[#allocation7 + $0xe8] sm:$0xff]   ;;  %v2673_v29 = vld [vmem:[#allocation7 + $0x70] sm:$0xff]  }
 0x235   : > { %1430 = vmatprep.subr.bf16.mxu1 %v2615_v37  ;;  %1536 = vmatprep.subr.bf16.mxu0 %v2618_v38  ;;  %v2672_v27 = vld [vmem:[#allocation7 + $0xa8] sm:$0xff]   ;;  %v2674_v30 = vld [vmem:[#allocation7 + $0xf0] sm:$0xff]   ;;  %v2677_v33 = vld [vmem:[#allocation7 + $0x78] sm:$0xff]   ;;  %v887_v38 = vsub.s32 3, %v3055_v48 }
 0x236   : > { %1415 = vmatprep.mubr.bf16.mxu1 %v773_v42  ;;  %1521 = vmatprep.mubr.bf16.mxu0 %v773_v42  ;;  %v2675_v31 = vld [vmem:[#allocation7 + $0x30] sm:$0xff]   ;;  %v2678_v34 = vld [vmem:[#allocation7 + $0xf8] sm:$0xff]  }
 0x237   : > { %1416 = vmatmul.mubr.bf16.gmra.mrb[12].mxu1 %v772_v41  ;;  %1522 = vmatmul.mubr.bf16.gmra.mrb[12].mxu0 %v772_v41  ;;  %v2676_v32 = vld [vmem:[#allocation7 + $0xb0] sm:$0xff]   ;;  %v2679_v35 = vld [vmem:[#allocation7 + $0x38] sm:$0xff]  }
 0x238   : > { %1431 = vmatpush1.bf16.msra.mxu1 %v2613_v43  ;;  %1537 = vmatpush1.bf16.msra.mxu0 %v2616_v44  ;;  %v2680_v36 = vld [vmem:[#allocation7 + $0xb8] sm:$0xff]   ;;  %v871_v37 = vld [vmem:[%s3154_s6] sm:$0xf] }
 0x239   : > { %1432 = vmatprep.subr.bf16.mxu1 %v2621_v45  ;;  %1538 = vmatprep.subr.bf16.mxu0 %v2624_v46  ;;  %v876_v39 = vrot.slane %v871_v37, %v514_v49  ;;  %v884_v40 = vrot.slane %v871_v37, %v522_v52  ;;  %v880_v41 = vrot.slane %v871_v37, %v518_v51 }
 0x23a   : > { %1458 = vmatprep.mubr.bf16.mxu1 %v2846_v28  ;;  %1564 = vmatprep.mubr.bf16.mxu0 %v2846_v28  ;;  %v888_v42 = vrot.slane %v871_v37, %v887_v38  ;;  %v2221_v37 = vld [vmem:[%s3156_s8] ss:$0 sm:$0xff] }
 0x23c   : > { %1433 = vmatpush1.bf16.msra.mxu1 %v2619_v47  ;;  %1539 = vmatpush1.bf16.msra.mxu0 %v2622_v50 }
 0x23d   : > { %1434 = vmatprep.subr.bf16.mxu1 %v2627_v53  ;;  %1540 = vmatprep.subr.bf16.mxu0 %v2630_v54 }
 0x240   : > { %1435 = vmatpush1.bf16.msra.mxu1 %v2625_v55  ;;  %1541 = vmatpush1.bf16.msra.mxu0 %v2628_v56 }
 0x241   : > { %1436 = vmatprep.subr.bf16.mxu1 %v2633_v57  ;;  %1542 = vmatprep.subr.bf16.mxu0 %v2636_v58 }
 0x244   : > { %1437 = vmatpush1.bf16.msra.mxu1 %v2631_v59  ;;  %1543 = vmatpush1.bf16.msra.mxu0 %v2634_v60 }
 0x245   : > { %1438 = vmatprep.subr.bf16.mxu1 %v2639_v61  ;;  %1544 = vmatprep.subr.bf16.mxu0 %v2642_v62 }
 0x248   : > { %1439 = vmatpush1.bf16.msra.mxu1 %v2637_v63  ;;  %1545 = vmatpush1.bf16.msra.mxu0 %v2640_v0 }
 0x249   : > { %1440 = vmatprep.subr.bf16.mxu1 %v2645_v1  ;;  %1546 = vmatprep.subr.bf16.mxu0 %v2648_v2 }
 0x24c   : > { %1441 = vmatpush1.bf16.msra.mxu1 %v2643_v3  ;;  %1547 = vmatpush1.bf16.msra.mxu0 %v2646_v4 }
 0x24d   : > { %2274 = vmatprep.subr.bf16.mxu1 %v2649_v5  ;;  %2302 = vmatprep.subr.bf16.mxu0 %v2650_v6 }
 0x24f   : > { %1459 = vmatmul.mubr.bf16.vlgmr.msra.gmra.mrb[8].mxu1 %v3071_v22  ;;  %1565 = vmatmul.mubr.bf16.vlgmr.msra.gmra.mrb[8].mxu0 %v3071_v22  ;;  %v2666_v22 = vld [vmem:[#allocation7 + $0xe0] sm:$0xff]  }
 0x250   : > { %1468 = vmatprep.mubr.bf16.mxu1 %v2846_v28  ;;  %1574 = vmatprep.mubr.bf16.mxu0 %v2846_v28  ;;  %v2663_v28 = vld [vmem:[#allocation7 + $0x18] sm:$0xff]  }
 0x251   : > { %2275 = vmatpush3.bf16.msra.mxu1 %v2651_v7  ;;  %2303 = vmatpush3.bf16.msra.mxu0 %v2652_v8 }
 0x252   : > { %2276 = vmatprep.subr.bf16.mxu1 %v2653_v9  ;;  %2304 = vmatprep.subr.bf16.mxu0 %v2654_v10 }
 0x255   : > { %2277 = vmatpush3.bf16.msra.mxu1 %v2655_v11  ;;  %2305 = vmatpush3.bf16.msra.mxu0 %v2656_v12 }
 0x256   : > { %2278 = vmatprep.subr.bf16.mxu1 %v2657_v13  ;;  %2306 = vmatprep.subr.bf16.mxu0 %v2658_v14 }
 0x257   : > { %1469 = vmatmul.mubr.bf16.gmra.mrb[12].mxu1 %v3069_v18  ;;  %1575 = vmatmul.mubr.bf16.gmra.mrb[12].mxu0 %v3069_v18  ;;  %v2671_v18 = vld [vmem:[#allocation7 + $0x28] sm:$0xff]  }
 0x259   : > { %2279 = vmatpush3.bf16.msra.mxu1 %v2659_v15  ;;  %2307 = vmatpush3.bf16.msra.mxu0 %v2660_v16 }
 0x25a   : > { %2280 = vmatprep.subr.bf16.mxu1 %v2661_v17  ;;  %2308 = vmatprep.subr.bf16.mxu0 %v2662_v19 }
 0x25d   : > { %2281 = vmatpush3.bf16.msra.mxu1 %v2663_v28  ;;  %2309 = vmatpush3.bf16.msra.mxu0 %v2664_v20 }
 0x25e   : > { %2282 = vmatprep.subr.bf16.mxu1 %v2665_v21  ;;  %2310 = vmatprep.subr.bf16.mxu0 %v2666_v22 }
 0x261   : > { %2283 = vmatpush3.bf16.msra.mxu1 %v2667_v23  ;;  %2311 = vmatpush3.bf16.msra.mxu0 %v2668_v24 }
 0x262   : > { %2284 = vmatprep.subr.bf16.mxu1 %v2669_v25  ;;  %2312 = vmatprep.subr.bf16.mxu0 %v2670_v26 }
 0x265   : > { %2285 = vmatpush3.bf16.msra.mxu1 %v2671_v18  ;;  %2313 = vmatpush3.bf16.msra.mxu0 %v2672_v27 }
 0x266   : > { %2286 = vmatprep.subr.bf16.mxu1 %v2673_v29  ;;  %2314 = vmatprep.subr.bf16.mxu0 %v2674_v30 }
 0x269   : > { %2287 = vmatpush3.bf16.msra.mxu1 %v2675_v31  ;;  %2315 = vmatpush3.bf16.msra.mxu0 %v2676_v32 }
 0x26a   : > { %2288 = vmatprep.subr.bf16.mxu1 %v2677_v33  ;;  %2316 = vmatprep.subr.bf16.mxu0 %v2678_v34 }
 0x26d   : > { %2289 = vmatpush3.bf16.msra.mxu1 %v2679_v35  ;;  %2317 = vmatpush3.bf16.msra.mxu0 %v2680_v36 }
 0x322   : > { %v1460_v43 = vpop.f32.mrb[8].mxu1  ;;  %v1566_v44 = vpop.f32.mrb[8].mxu0 }
 0x323   : > { %v2358_v45 = vadd.f32 %v1460_v43, %v876_v39  ;;  %v2366_v46 = vadd.f32 %v1566_v44, %v884_v40  ;;  %v1462_v47 = vpop.f32.mrb[9].mxu1  ;;  %v1568_v50 = vpop.f32.mrb[9].mxu0 }
 0x324   : > { %v2359_v53 = vadd.f32 %v1462_v47, %v880_v41  ;;  %v2367_v54 = vadd.f32 %v1568_v50, %v888_v42  ;;  %v1464_v55 = vpop.f32.mrb[10].mxu1  ;;  %v1570_v56 = vpop.f32.mrb[10].mxu0 }
 0x325   : > { %v2360_v57 = vadd.f32 %v1464_v55, %v876_v39  ;;  %v2368_v58 = vadd.f32 %v1570_v56, %v884_v40  ;;  %v1466_v49 = vpop.f32.mrb[11].mxu1  ;;  %v1572_v59 = vpop.f32.mrb[11].mxu0  ;;  %v1585_v61 = vmax.f32 %v2358_v45, 0.0  ;;  %v1587_v48 = vmax.f32 %v2366_v46, 0.0 }
 0x326   : > { %v2361_v60 = vadd.f32 %v1466_v49, %v880_v41  ;;  %v2369_v52 = vadd.f32 %v1572_v59, %v888_v42  ;;  %v1586_v63 = vmax.f32 %v2359_v53, 0.0  ;;  %v1588_v0 = vmax.f32 %v2367_v54, 0.0 }
 0x327   : > { %v1589_v51 = vmax.f32 %v2360_v57, 0.0  ;;  %v1591_v62 = vmax.f32 %v2368_v58, 0.0 }
 0x328   : > { %v1590_v1 = vmax.f32 %v2361_v60, 0.0  ;;  %v1592_v2 = vmax.f32 %v2369_v52, 0.0 }
 0x329   : > { %v1601_v3 = vpack.c.bf16 %v1589_v51, %v1585_v61  ;;  %v1603_v4 = vpack.c.bf16 %v1591_v62, %v1587_v48 }
 0x32a   : > { %v1602_v5 = vpack.c.bf16 %v1590_v1, %v1586_v63  ;;  %v1604_v6 = vpack.c.bf16 %v1592_v2, %v1588_v0  ;;  %v1470_v7 = vpop.f32.mrb[12].mxu1  ;;  %v1576_v8 = vpop.f32.mrb[12].mxu0 }
 0x32b   : > { %v2362_v9 = vadd.f32 %v1470_v7, %v876_v39  ;;  %v2370_v10 = vadd.f32 %v1576_v8, %v884_v40  ;;  %v1472_v11 = vpop.f32.mrb[13].mxu1  ;;  %v1578_v12 = vpop.f32.mrb[13].mxu0 }
 0x32c   : > { %v2363_v13 = vadd.f32 %v1472_v11, %v880_v41  ;;  %v2371_v14 = vadd.f32 %v1578_v12, %v888_v42  ;;  %v1474_v15 = vpop.f32.mrb[14].mxu1  ;;  %v1580_v16 = vpop.f32.mrb[14].mxu0  ;;  %1904 = vmatprep.mubr.bf16.mxu1 %v1602_v5  ;;  %1953 = vmatprep.mubr.bf16.mxu0 %v1604_v6 }
 0x32d   : > { %v2364_v17 = vadd.f32 %v1474_v15, %v876_v39  ;;  %v2372_v19 = vadd.f32 %v1580_v16, %v884_v40  ;;  %v1476_v28 = vpop.f32.mrb[15].mxu1  ;;  %v1582_v20 = vpop.f32.mrb[15].mxu0  ;;  %1905 = vmatmul.mubr.bf16.vlgmr.msra.gmra.mrb[16].mxu1 %v1601_v3  ;;  %1954 = vmatmul.mubr.bf16.vlgmr.msra.gmra.mrb[16].mxu0 %v1603_v4  ;;  %v1593_v23 = vmax.f32 %v2362_v9, 0.0  ;;  %v1595_v24 = vmax.f32 %v2370_v10, 0.0 }
 0x32e   : > { %v2365_v21 = vadd.f32 %v1476_v28, %v880_v41  ;;  %v2373_v22 = vadd.f32 %v1582_v20, %v888_v42  ;;  %v1594_v18 = vmax.f32 %v2363_v13, 0.0  ;;  %v1596_v27 = vmax.f32 %v2371_v14, 0.0 }
 0x32f   : > { %v1597_v25 = vmax.f32 %v2364_v17, 0.0  ;;  %v1599_v26 = vmax.f32 %v2372_v19, 0.0 }
 0x330   : > { %v1598_v29 = vmax.f32 %v2365_v21, 0.0  ;;  %v1600_v30 = vmax.f32 %v2373_v22, 0.0 }
 0x331   : > { %v1605_v31 = vpack.c.bf16 %v1597_v25, %v1593_v23  ;;  %v1607_v32 = vpack.c.bf16 %v1599_v26, %v1595_v24 }
 0x332   : > { %v1606_v33 = vpack.c.bf16 %v1598_v29, %v1594_v18  ;;  %v1608_v34 = vpack.c.bf16 %v1600_v30, %v1596_v27 }
 0x334   : > { %1912 = vmatprep.mubr.bf16.mxu1 %v1606_v33  ;;  %1961 = vmatprep.mubr.bf16.mxu0 %v1608_v34 }
 0x335   : > { %1913 = vmatmul.mubr.bf16.gmra.mrb[20].mxu1 %v1605_v31  ;;  %1962 = vmatmul.mubr.bf16.gmra.mrb[20].mxu0 %v1607_v32 }
 0x400   : > { %v2290_v35 = vpop.f32.mrb[16].mxu1  ;;  %v2318_v36 = vpop.f32.mrb[16].mxu0 }
 0x401   : > { %v2291_v38 = vpop.f32.mrb[17].mxu1  ;;  %v2319_v39 = vpop.f32.mrb[17].mxu0 }
 0x402   : > { %v2292_v40 = vadd.f32 %v2291_v38, %v2290_v35  ;;  %v2320_v41 = vadd.f32 %v2319_v39, %v2318_v36  ;;  %v2293_v42 = vpop.f32.mrb[18].mxu1  ;;  %v2321_v43 = vpop.f32.mrb[18].mxu0 }
 0x403   : > { %v2294_v44 = vpop.f32.mrb[19].mxu1  ;;  %v2322_v45 = vpop.f32.mrb[19].mxu0 }
 0x404   : > { %v1907_v46 = vadd.f32 %v2292_v40, %v2221_v37  ;;  %v2295_v47 = vadd.f32 %v2294_v44, %v2293_v42  ;;  %v2323_v50 = vadd.f32 %v2322_v45, %v2321_v43 }
 0x406   : > { %v1956_v53 = vadd.f32 %v2320_v41, %v1907_v46  ;;  %v1910_v54 = vadd.f32 %v2295_v47, %v2221_v37 }
 0x408   : > { %1970 = vst [vmem:[%s370_s20] sm:$0xff] %v1956_v53  ;;  %v1959_v55 = vadd.f32 %v2323_v50, %v1910_v54  ;;  %v2296_v56 = vpop.f32.mrb[20].mxu1  ;;  %v2324_v57 = vpop.f32.mrb[20].mxu0 }
 0x409   : > { %v2297_v58 = vpop.f32.mrb[21].mxu1  ;;  %v2325_v49 = vpop.f32.mrb[21].mxu0 }
 0x40a   : > { %1971 = vst [vmem:[%s370_s20 + $0x8] sm:$0xff] %v1959_v55  ;;  %v2298_v59 = vadd.f32 %v2297_v58, %v2296_v56  ;;  %v2326_v60 = vadd.f32 %v2325_v49, %v2324_v57  ;;  %v2299_v52 = vpop.f32.mrb[22].mxu1  ;;  %v2327_v61 = vpop.f32.mrb[22].mxu0 }
 0x40b   : > { %v2300_v48 = vpop.f32.mrb[23].mxu1  ;;  %v2328_v51 = vpop.f32.mrb[23].mxu0 }
 0x40c   : > { %v1915_v62 = vadd.f32 %v2298_v59, %v2221_v37  ;;  %v2301_v63 = vadd.f32 %v2300_v48, %v2299_v52  ;;  %v2329_v0 = vadd.f32 %v2328_v51, %v2327_v61 }
 0x40e   : > { %v1964_v1 = vadd.f32 %v2326_v60, %v1915_v62  ;;  %v1918_v2 = vadd.f32 %v2301_v63, %v2221_v37 }
 0x410   : > { %1972 = vst [vmem:[%s370_s20 + $0x10] sm:$0xff] %v1964_v1  ;;  %v1967_v3 = vadd.f32 %v2329_v0, %v1918_v2 }
 0x412   : > { %1973 = vst [vmem:[%s370_s20 + $0x18] sm:$0xff] %v1967_v3 }
 0x413   : > { %2778 = shalt.err (!%p2775_p11)
}
 0x414   : > { %s2779_s26 = scalar_lea.hbm %s3103_s29, 512  ;;  %s2783_s18 = scalar_lea.hbm %s3157_s9, 1024 }
 0x415   : > { %p2780_p13 = scmp.ne.s32.totalorder %s3103_s29, %s2779_s26  ;;  %p2784_p6 = scmp.lt.u32.totalorder %s3103_s29, %s3157_s9 }
 0x416   : > { %p2785_p9 = scmp.lt.u32.totalorder %s2783_s18, %s2779_s26  ;;  %p2787_p12 = scmp.lt.u32.totalorder %s2779_s26, %s3103_s29 }
 0x417   : > { %p2781_p5 = pnand %p2780_p13, %p3181_p1 }
 0x418   : > { %p2786_p10 = por %p2785_p9, %p2784_p6 }
 0x419   : > { %p2782_p0 = pneg %p2781_p5 }
 0x41a   : > { %p2788_p2 = por %p2787_p12, %p2786_p10 }
 0x41c   : > { %p2789_p3 = pnand %p2788_p2, %p2782_p0 }
 0x41e   : > { %2792 = shalt.err (!%p2789_p3)
}
 0x41f   : > { %s2848_s17 = smov 128   ;;  %s2849_s20 = smov 8  }
 0x420   : > { %2402 = dma.vmem_to_hbm [thread:$0]  (%p3181_p1), %s3098_s21, 512, %s3103_s29, %s3107_s22, %s2848_s17, %s2848_s17, %s2849_s20  }
 0x421 PF: > { %s3182_s28 = sld [smem:[#allocation15_spill]]  ;;  %p2424_p4 = scmp.ge.s32.totalorder %s2835_s12, 2 }
 0x422   : > { %s2003_s14 = sand.u32 1, %s2823_s30  }
 0x423   : > { %s2004_s16 = scalar_lea.sflag [#allocation4], %s2003_s14 }
 0x427   : > { %p3183_p7 = scmp.ne.s32.totalorder %s3182_s28, 0 }
 0x429   : > { %p2415_p8 = pnand %p2424_p4, %p3183_p7 }
 0x42b   : > { %2818 = dma.done.wait (!%p2415_p8), %s2004_s16, 512  }
 0x42c   : > { %2820 = vsyncadd (!%p2415_p8), %s2004_s16, 4294966784  ;;  %s3184_s12 = sld [smem:[#allocation13_spill]]  ;;  %s3185_s25 = sld [smem:[#allocation12_spill]] }
 0x42d   : > { %s3186_s11 = sld [smem:[#allocation14_spill]]  ;;  %s3187_s30 = smov %s2827_s10 }
 0x432   : > { %p21_p11 = scmp.ge.s32.totalorder %s3184_s12, 4   ;;  %s3188_s10 = smov %s3185_s25 }
 0x434   :  { %23 = sbr.rel (!%p21_p11) target bundleno = 7 (0x7), region = 104 }
 0x43b   :  { %2009 = vsyncpa [#allocation3], 1 }
 0x43c   :  { %2011 = vsyncpa [#allocation3 + $0x1], 1 }
 0x43d   :  { %2012 = vsyncpa [#allocation6], 1 }
 0x43e   :  { %2013 = vsyncpa [#allocation4], 1 }
 0x43f   :  { %2015 = vsyncpa [#allocation4 + $0x1], 1 }

</bundles_post_ra>
